<compile_context>
chip_gen: v7x
topology: tpu7x:2x2x1
jax: 0.10.0
libtpu: 0.0.40
codegen_flags: <defaults>
</compile_context>

<pallas_src>
import jax
import jax.numpy as jnp
from jax.experimental import pallas as pl
from jax.experimental.pallas import tpu as pltpu


# MXU operand dtype: bf16 gives ~3x MXU throughput on v6e/v7x and halves operand VMEM
# bytes; accumulation is f32 (preferred_element_type) and all element-wise work (bias
# add, ReLU) stays f32 so v5e's bf16-less VPU/EUP is unaffected.
_MXU_DTYPE = jnp.bfloat16


def _mxu_dot(a, b):
    return jnp.dot(a.astype(_MXU_DTYPE), b.astype(_MXU_DTYPE),
                   preferred_element_type=jnp.float32)


def _gcn(a_hat, x, w, b):
    # GCNEncoderLayer forward: A_hat @ (X @ W) + bias, then ReLU (f32 epilogue).
    return jnp.maximum(_mxu_dot(a_hat, _mxu_dot(x, w)) + b, 0.0)


# ----------------------------------------------------------------------------
# Fused GripNet forward kernel
# ----------------------------------------------------------------------------
def _gripnet_fused_kernel(
    nfA_ref, embA_ref, aA_ref, wA1_ref, bA1_ref, wA2_ref, bA2_ref,
    aS_ref, wE_ref, bE_ref,
    nfB_ref, embB_ref, aB_ref, wB1_ref, bB1_ref, wB2_ref, bB2_ref,
    o_ref,
):
    # ---- supervertex A (start): internal feature layer + internal GCN stack ----
    xA = _mxu_dot(nfA_ref[...], embA_ref[...])                   # [NA, 16]
    hA = _gcn(aA_ref[...], xA, wA1_ref[...], bA1_ref[...])       # [NA, 16]
    outA = _gcn(aA_ref[...], hA, wA2_ref[...], bA2_ref[...])     # [NA, 16] (concat_output=False)

    # ---- external module A -> B (rectangular normalized bipartite adjacency) ----
    h_ext = _gcn(aS_ref[...], outA, wE_ref[...], bE_ref[...])    # [NB, 16]

    # ---- supervertex B (task): internal feature layer, mode='cat' ----
    xB = _mxu_dot(nfB_ref[...], embB_ref[...])                   # [NB, 16]
    xcat = jnp.concatenate([xB, h_ext], axis=1)                  # [NB, 32]

    # internal GCN stack of B, concat_output=True
    h1 = _gcn(aB_ref[...], xcat, wB1_ref[...], bB1_ref[...])     # [NB, 24]
    h2 = _gcn(aB_ref[...], h1, wB2_ref[...], bB2_ref[...])       # [NB, 16]

    # single lane-packed write of the concatenated output [NB, 32 + 24 + 16]
    o_ref[...] = jnp.concatenate([xcat, h1, h2], axis=1)


@jax.jit
def gripnet_forward_fused(node_feat_A, emb_A, a_hat_A, wA1, bA1, wA2, bA2,
                          a_sub, wE, bE, node_feat_B, emb_B, a_hat_B,
                          wB1, bB1, wB2, bB2):
    NA, FA = node_feat_A.shape
    NB, FB = node_feat_B.shape
    fA, fB = emb_A.shape[1], emb_B.shape[1]
    aggA = (wA1.shape[1], wA2.shape[1])
    extB = wE.shape[1]
    aggB = (wB1.shape[1], wB2.shape[1])
    out_channels = fB + extB + aggB[0] + aggB[1]

    inputs = (
        node_feat_A, emb_A, a_hat_A,
        wA1, bA1.reshape(1, -1), wA2, bA2.reshape(1, -1),
        a_sub, wE, bE.reshape(1, -1),
        node_feat_B, emb_B, a_hat_B,
        wB1, bB1.reshape(1, -1), wB2, bB2.reshape(1, -1),
    )

    def gcn_flops(n_out, n_src, f_in, f_out):
        return 2 * n_src * f_in * f_out + 2 * n_out * n_src * f_out

    flops = (
        2 * NA * FA * fA
        + gcn_flops(NA, NA, fA, aggA[0]) + gcn_flops(NA, NA, aggA[0], aggA[1])
        + gcn_flops(NB, NA, aggA[1], extB)
        + 2 * NB * FB * fB
        + gcn_flops(NB, NB, fB + extB, aggB[0]) + gcn_flops(NB, NB, aggB[0], aggB[1])
    )
    bytes_accessed = (sum(int(x.size) * x.dtype.itemsize for x in inputs)
                      + NB * out_channels * 4)

    vmem = pltpu.MemorySpace.VMEM
    return pl.pallas_call(
        _gripnet_fused_kernel,
        out_shape=jax.ShapeDtypeStruct((NB, out_channels), jnp.float32),
        in_specs=[pl.BlockSpec(memory_space=vmem) for _ in inputs],
        out_specs=pl.BlockSpec(memory_space=vmem),
        cost_estimate=pl.CostEstimate(flops=flops, transcendentals=0,
                                      bytes_accessed=bytes_accessed),
    )(*inputs)


# ----------------------------------------------------------------------------
# Glue: GCN symmetric normalization (kale GCNEncoderLayer.norm) -> dense A_hat.
# Precomputed once per graph (depends only on edge_index, not on params/activations).
# TODO(synk): the COO scatter-add degree normalization has no clean Pallas equivalent;
# it stays plain-JAX glue that materializes the dense normalized adjacency.
# ----------------------------------------------------------------------------
def gcn_norm_dense(edge_index, num_nodes, edge_weight=None):
    """GCNEncoderLayer.norm (add self-loops, deg scattered on row, sym-normalize) as a
    dense [num_nodes, num_nodes] matrix with A_hat[col, row] = norm(edge), so that
    out[i] = sum_j A_hat[i, j] * (XW)[j]."""
    row = edge_index[0].astype(jnp.int32)
    col = edge_index[1].astype(jnp.int32)
    if edge_weight is None:
        edge_weight = jnp.ones((row.shape[0],), jnp.float32)
    loop = jnp.arange(num_nodes, dtype=jnp.int32)
    row = jnp.concatenate([row, loop])
    col = jnp.concatenate([col, loop])
    ew = jnp.concatenate([edge_weight, jnp.ones((num_nodes,), jnp.float32)])
    deg = jnp.zeros((num_nodes,), jnp.float32).at[row].add(ew)
    dis = jnp.where(deg > 0.0, 1.0 / jnp.sqrt(deg), 0.0)
    norm = dis[row] * ew * dis[col]
    return jnp.zeros((num_nodes, num_nodes), jnp.float32).at[col, row].add(norm)


def gcn_norm_bipartite_dense(edge_index_ab, num_src, num_dst, edge_weight=None):
    """Rectangular [num_dst, num_src] normalized adjacency matching the
    GripNetExternalModule construction (pad x with zeros for the num_dst output nodes,
    run GCNEncoderLayer.norm on the (num_src+num_dst)-node bigraph, slice [num_src:, :num_src]).

    On that bigraph, degrees are scattered on the *source* index, so output-node degrees
    are exactly 1 (their own self-loop) and the dropped self-loop columns only ever
    multiply zero-padded features -> building the rectangle directly is numerically
    identical while avoiding the (num_src+num_dst)^2 materialization."""
    src = edge_index_ab[0].astype(jnp.int32)
    dst = edge_index_ab[1].astype(jnp.int32)
    if edge_weight is None:
        edge_weight = jnp.ones((src.shape[0],), jnp.float32)
    deg_src = jnp.ones((num_src,), jnp.float32).at[src].add(edge_weight)  # +1 = self-loop
    dis_src = jnp.where(deg_src > 0.0, 1.0 / jnp.sqrt(deg_src), 0.0)
    norm = dis_src[src] * edge_weight  # dis of an output node == 1/sqrt(1)
    return jnp.zeros((num_dst, num_src), jnp.float32).at[dst, src].add(norm)


# ----------------------------------------------------------------------------
# Parameter init (deterministic, mirrors module shapes)
# ----------------------------------------------------------------------------
def glorot(key, shape):
    fan_in, fan_out = shape
    limit = (6.0 / (fan_in + fan_out)) ** 0.5
    return jax.random.uniform(key, shape, jnp.float32, -limit, limit)


def make_gcn_params(key, f_in, f_out):
    return {"w": glorot(key, (f_in, f_out)), "b": jnp.zeros((f_out,), jnp.float32)}


# ----------------------------------------------------------------------------
# main
# ----------------------------------------------------------------------------
if __name__ == "__main__":
    key = jax.random.PRNGKey(0)
    keys = jax.random.split(key, 16)

    # sizes
    NA, FA = 24, 32      # supervertex A: nodes, raw features
    NB, FB = 16, 16      # supervertex B: nodes, raw features
    FEAT_A = 16          # A: inter_feat_channels
    AGG_A = [16, 16]     # A: inter_agg_channels_list
    FEAT_B = 16          # B: inter_feat_channels
    EXT_B = 16           # B: exter_agg_channels_dict['A']
    AGG_B = [24, 16]     # B: inter_agg_channels_list

    # node features
    node_feat_A = jax.random.normal(keys[0], (NA, FA), jnp.float32)
    node_feat_B = jax.random.normal(keys[1], (NB, FB), jnp.float32)

    # edges (no self loops within a supervertex)
    EA, EB, EAB = 40, 32, 48
    rowA = jax.random.randint(keys[2], (EA,), 0, NA)
    colA = (rowA + jax.random.randint(keys[3], (EA,), 1, NA)) % NA
    edge_index_A = jnp.stack([rowA, colA]).astype(jnp.int32)

    rowB = jax.random.randint(keys[4], (EB,), 0, NB)
    colB = (rowB + jax.random.randint(keys[5], (EB,), 1, NB)) % NB
    edge_index_B = jnp.stack([rowB, colB]).astype(jnp.int32)

    rowAB = jax.random.randint(keys[6], (EAB,), 0, NA)
    colAB = jax.random.randint(keys[7], (EAB,), 0, NB)
    edge_index_AB = jnp.stack([rowAB, colAB]).astype(jnp.int32)

    # parameters
    params = {
        # internal feature layers (torch.nn.Parameter(...).normal_())
        "emb_A": jax.random.normal(keys[8], (FA, FEAT_A), jnp.float32),
        "emb_B": jax.random.normal(keys[9], (FB, FEAT_B), jnp.float32),
        # internal GCN stack of A: [FEAT_A] + AGG_A
        "gcn_A": [
            make_gcn_params(keys[10], FEAT_A, AGG_A[0]),
            make_gcn_params(keys[11], AGG_A[0], AGG_A[1]),
        ],
        # external module A->B: GCN(out_channels_A=AGG_A[-1], EXT_B)
        "ext_AB": make_gcn_params(keys[12], AGG_A[-1], EXT_B),
        # internal GCN stack of B: [FEAT_B + EXT_B] + AGG_B   (mode='cat')
        "gcn_B": [
            make_gcn_params(keys[13], FEAT_B + EXT_B, AGG_B[0]),
            make_gcn_params(keys[14], AGG_B[0], AGG_B[1]),
        ],
    }

    # precompute normalized adjacencies ONCE per graph (hoisted out of the forward)
    a_hat_A = gcn_norm_dense(edge_index_A, NA)
    a_hat_B = gcn_norm_dense(edge_index_B, NB)
    a_sub = gcn_norm_bipartite_dense(edge_index_AB, NA, NB)

    out = gripnet_forward_fused(
        node_feat_A, params["emb_A"], a_hat_A,
        params["gcn_A"][0]["w"], params["gcn_A"][0]["b"],
        params["gcn_A"][1]["w"], params["gcn_A"][1]["b"],
        a_sub, params["ext_AB"]["w"], params["ext_AB"]["b"],
        node_feat_B, params["emb_B"], a_hat_B,
        params["gcn_B"][0]["w"], params["gcn_B"][0]["b"],
        params["gcn_B"][1]["w"], params["gcn_B"][1]["b"],
    )
    out = jax.block_until_ready(out)

    expected_out_channels = (FEAT_B + EXT_B) + sum(AGG_B)  # concat_output=True -> 72
    assert out.shape == (NB, expected_out_channels), out.shape
    assert out.dtype == jnp.float32
    assert bool(jnp.all(jnp.isfinite(out)))
    print("KERNEL_OK")
</pallas_src>

<mosaic_0001>
module attributes {stable_mosaic.version = 11 : i64} {
  func.func @_gripnet_fused_kernel(%arg0: memref<24x32xf32, #tpu.memory_space<vmem>>, %arg1: memref<32x16xf32, #tpu.memory_space<vmem>>, %arg2: memref<24x24xf32, #tpu.memory_space<vmem>>, %arg3: memref<16x16xf32, #tpu.memory_space<vmem>>, %arg4: memref<1x16xf32, #tpu.memory_space<vmem>>, %arg5: memref<16x16xf32, #tpu.memory_space<vmem>>, %arg6: memref<1x16xf32, #tpu.memory_space<vmem>>, %arg7: memref<16x24xf32, #tpu.memory_space<vmem>>, %arg8: memref<16x16xf32, #tpu.memory_space<vmem>>, %arg9: memref<1x16xf32, #tpu.memory_space<vmem>>, %arg10: memref<16x16xf32, #tpu.memory_space<vmem>>, %arg11: memref<16x16xf32, #tpu.memory_space<vmem>>, %arg12: memref<16x16xf32, #tpu.memory_space<vmem>>, %arg13: memref<32x24xf32, #tpu.memory_space<vmem>>, %arg14: memref<1x24xf32, #tpu.memory_space<vmem>>, %arg15: memref<24x16xf32, #tpu.memory_space<vmem>>, %arg16: memref<1x16xf32, #tpu.memory_space<vmem>>, %arg17: memref<16x72xf32, #tpu.memory_space<vmem>>) attributes {dimension_semantics = [], scalar_prefetch = 0 : i64, scratch_operands = 0 : i64, tpu.core_type = #tpu.core_type<tc>} {
    %c0 = arith.constant 0 : index
    %c0_0 = arith.constant 0 : index
    %0 = vector.load %arg0[%c0, %c0_0] : memref<24x32xf32, #tpu.memory_space<vmem>>, vector<24x32xf32>
    %c0_1 = arith.constant 0 : index
    %c0_2 = arith.constant 0 : index
    %1 = vector.load %arg1[%c0_1, %c0_2] : memref<32x16xf32, #tpu.memory_space<vmem>>, vector<32x16xf32>
    %2 = arith.truncf %0 : vector<24x32xf32> to vector<24x32xbf16>
    %3 = arith.truncf %1 : vector<32x16xf32> to vector<32x16xbf16>
    %cst = arith.constant dense<0.000000e+00> : vector<24x16xf32>
    %4 = tpu.matmul %2, %3, %cst {dimension_numbers = #tpu.dot_dimension_numbers<[1], [0], [0], [1], [0, 0, 1, 1], [], []>} : vector<24x32xbf16>, vector<32x16xbf16>, vector<24x16xf32> -> vector<24x16xf32>
    %c0_3 = arith.constant 0 : index
    %c0_4 = arith.constant 0 : index
    %5 = vector.load %arg2[%c0_3, %c0_4] : memref<24x24xf32, #tpu.memory_space<vmem>>, vector<24x24xf32>
    %c0_5 = arith.constant 0 : index
    %c0_6 = arith.constant 0 : index
    %6 = vector.load %arg3[%c0_5, %c0_6] : memref<16x16xf32, #tpu.memory_space<vmem>>, vector<16x16xf32>
    %c0_7 = arith.constant 0 : index
    %c0_8 = arith.constant 0 : index
    %7 = vector.load %arg4[%c0_7, %c0_8] : memref<1x16xf32, #tpu.memory_space<vmem>>, vector<1x16xf32>
    %8 = arith.truncf %4 : vector<24x16xf32> to vector<24x16xbf16>
    %9 = arith.truncf %6 : vector<16x16xf32> to vector<16x16xbf16>
    %cst_9 = arith.constant dense<0.000000e+00> : vector<24x16xf32>
    %10 = tpu.matmul %8, %9, %cst_9 {dimension_numbers = #tpu.dot_dimension_numbers<[1], [0], [0], [1], [0, 0, 1, 1], [], []>} : vector<24x16xbf16>, vector<16x16xbf16>, vector<24x16xf32> -> vector<24x16xf32>
    %11 = arith.truncf %5 : vector<24x24xf32> to vector<24x24xbf16>
    %12 = arith.truncf %10 : vector<24x16xf32> to vector<24x16xbf16>
    %cst_10 = arith.constant dense<0.000000e+00> : vector<24x16xf32>
    %13 = tpu.matmul %11, %12, %cst_10 {dimension_numbers = #tpu.dot_dimension_numbers<[1], [0], [0], [1], [0, 0, 1, 1], [], []>} : vector<24x24xbf16>, vector<24x16xbf16>, vector<24x16xf32> -> vector<24x16xf32>
    %14 = vector.broadcast %7 : vector<1x16xf32> to vector<24x16xf32>
    %15 = arith.addf %13, %14 : vector<24x16xf32>
    %cst_11 = arith.constant 0.000000e+00 : f32
    %16 = vector.broadcast %cst_11 : f32 to vector<24x16xf32>
    %17 = arith.maximumf %15, %16 : vector<24x16xf32>
    %c0_12 = arith.constant 0 : index
    %c0_13 = arith.constant 0 : index
    %18 = vector.load %arg2[%c0_12, %c0_13] : memref<24x24xf32, #tpu.memory_space<vmem>>, vector<24x24xf32>
    %c0_14 = arith.constant 0 : index
    %c0_15 = arith.constant 0 : index
    %19 = vector.load %arg5[%c0_14, %c0_15] : memref<16x16xf32, #tpu.memory_space<vmem>>, vector<16x16xf32>
    %c0_16 = arith.constant 0 : index
    %c0_17 = arith.constant 0 : index
    %20 = vector.load %arg6[%c0_16, %c0_17] : memref<1x16xf32, #tpu.memory_space<vmem>>, vector<1x16xf32>
    %21 = arith.truncf %17 : vector<24x16xf32> to vector<24x16xbf16>
    %22 = arith.truncf %19 : vector<16x16xf32> to vector<16x16xbf16>
    %cst_18 = arith.constant dense<0.000000e+00> : vector<24x16xf32>
    %23 = tpu.matmul %21, %22, %cst_18 {dimension_numbers = #tpu.dot_dimension_numbers<[1], [0], [0], [1], [0, 0, 1, 1], [], []>} : vector<24x16xbf16>, vector<16x16xbf16>, vector<24x16xf32> -> vector<24x16xf32>
    %24 = arith.truncf %18 : vector<24x24xf32> to vector<24x24xbf16>
    %25 = arith.truncf %23 : vector<24x16xf32> to vector<24x16xbf16>
    %cst_19 = arith.constant dense<0.000000e+00> : vector<24x16xf32>
    %26 = tpu.matmul %24, %25, %cst_19 {dimension_numbers = #tpu.dot_dimension_numbers<[1], [0], [0], [1], [0, 0, 1, 1], [], []>} : vector<24x24xbf16>, vector<24x16xbf16>, vector<24x16xf32> -> vector<24x16xf32>
    %27 = vector.broadcast %20 : vector<1x16xf32> to vector<24x16xf32>
    %28 = arith.addf %26, %27 : vector<24x16xf32>
    %cst_20 = arith.constant 0.000000e+00 : f32
    %29 = vector.broadcast %cst_20 : f32 to vector<24x16xf32>
    %30 = arith.maximumf %28, %29 : vector<24x16xf32>
    %c0_21 = arith.constant 0 : index
    %c0_22 = arith.constant 0 : index
    %31 = vector.load %arg7[%c0_21, %c0_22] : memref<16x24xf32, #tpu.memory_space<vmem>>, vector<16x24xf32>
    %c0_23 = arith.constant 0 : index
    %c0_24 = arith.constant 0 : index
    %32 = vector.load %arg8[%c0_23, %c0_24] : memref<16x16xf32, #tpu.memory_space<vmem>>, vector<16x16xf32>
    %c0_25 = arith.constant 0 : index
    %c0_26 = arith.constant 0 : index
    %33 = vector.load %arg9[%c0_25, %c0_26] : memref<1x16xf32, #tpu.memory_space<vmem>>, vector<1x16xf32>
    %34 = arith.truncf %30 : vector<24x16xf32> to vector<24x16xbf16>
    %35 = arith.truncf %32 : vector<16x16xf32> to vector<16x16xbf16>
    %cst_27 = arith.constant dense<0.000000e+00> : vector<24x16xf32>
    %36 = tpu.matmul %34, %35, %cst_27 {dimension_numbers = #tpu.dot_dimension_numbers<[1], [0], [0], [1], [0, 0, 1, 1], [], []>} : vector<24x16xbf16>, vector<16x16xbf16>, vector<24x16xf32> -> vector<24x16xf32>
    %37 = arith.truncf %31 : vector<16x24xf32> to vector<16x24xbf16>
    %38 = arith.truncf %36 : vector<24x16xf32> to vector<24x16xbf16>
    %cst_28 = arith.constant dense<0.000000e+00> : vector<16x16xf32>
    %39 = tpu.matmul %37, %38, %cst_28 {dimension_numbers = #tpu.dot_dimension_numbers<[1], [0], [0], [1], [0, 0, 1, 1], [], []>} : vector<16x24xbf16>, vector<24x16xbf16>, vector<16x16xf32> -> vector<16x16xf32>
    %40 = vector.broadcast %33 : vector<1x16xf32> to vector<16x16xf32>
    %41 = arith.addf %39, %40 : vector<16x16xf32>
    %cst_29 = arith.constant 0.000000e+00 : f32
    %42 = vector.broadcast %cst_29 : f32 to vector<16x16xf32>
    %43 = arith.maximumf %41, %42 : vector<16x16xf32>
    %c0_30 = arith.constant 0 : index
    %c0_31 = arith.constant 0 : index
    %44 = vector.load %arg10[%c0_30, %c0_31] : memref<16x16xf32, #tpu.memory_space<vmem>>, vector<16x16xf32>
    %c0_32 = arith.constant 0 : index
    %c0_33 = arith.constant 0 : index
    %45 = vector.load %arg11[%c0_32, %c0_33] : memref<16x16xf32, #tpu.memory_space<vmem>>, vector<16x16xf32>
    %46 = arith.truncf %44 : vector<16x16xf32> to vector<16x16xbf16>
    %47 = arith.truncf %45 : vector<16x16xf32> to vector<16x16xbf16>
    %cst_34 = arith.constant dense<0.000000e+00> : vector<16x16xf32>
    %48 = tpu.matmul %46, %47, %cst_34 {dimension_numbers = #tpu.dot_dimension_numbers<[1], [0], [0], [1], [0, 0, 1, 1], [], []>} : vector<16x16xbf16>, vector<16x16xbf16>, vector<16x16xf32> -> vector<16x16xf32>
    %49 = tpu.concatenate %48, %43 in 1 : vector<16x16xf32>, vector<16x16xf32> -> vector<16x32xf32>
    %c0_35 = arith.constant 0 : index
    %c0_36 = arith.constant 0 : index
    %50 = vector.load %arg12[%c0_35, %c0_36] : memref<16x16xf32, #tpu.memory_space<vmem>>, vector<16x16xf32>
    %c0_37 = arith.constant 0 : index
    %c0_38 = arith.constant 0 : index
    %51 = vector.load %arg13[%c0_37, %c0_38] : memref<32x24xf32, #tpu.memory_space<vmem>>, vector<32x24xf32>
    %c0_39 = arith.constant 0 : index
    %c0_40 = arith.constant 0 : index
    %52 = vector.load %arg14[%c0_39, %c0_40] : memref<1x24xf32, #tpu.memory_space<vmem>>, vector<1x24xf32>
    %53 = arith.truncf %49 : vector<16x32xf32> to vector<16x32xbf16>
    %54 = arith.truncf %51 : vector<32x24xf32> to vector<32x24xbf16>
    %cst_41 = arith.constant dense<0.000000e+00> : vector<16x24xf32>
    %55 = tpu.matmul %53, %54, %cst_41 {dimension_numbers = #tpu.dot_dimension_numbers<[1], [0], [0], [1], [0, 0, 1, 1], [], []>} : vector<16x32xbf16>, vector<32x24xbf16>, vector<16x24xf32> -> vector<16x24xf32>
    %56 = arith.truncf %50 : vector<16x16xf32> to vector<16x16xbf16>
    %57 = arith.truncf %55 : vector<16x24xf32> to vector<16x24xbf16>
    %cst_42 = arith.constant dense<0.000000e+00> : vector<16x24xf32>
    %58 = tpu.matmul %56, %57, %cst_42 {dimension_numbers = #tpu.dot_dimension_numbers<[1], [0], [0], [1], [0, 0, 1, 1], [], []>} : vector<16x16xbf16>, vector<16x24xbf16>, vector<16x24xf32> -> vector<16x24xf32>
    %59 = vector.broadcast %52 : vector<1x24xf32> to vector<16x24xf32>
    %60 = arith.addf %58, %59 : vector<16x24xf32>
    %cst_43 = arith.constant 0.000000e+00 : f32
    %61 = vector.broadcast %cst_43 : f32 to vector<16x24xf32>
    %62 = arith.maximumf %60, %61 : vector<16x24xf32>
    %c0_44 = arith.constant 0 : index
    %c0_45 = arith.constant 0 : index
    %63 = vector.load %arg12[%c0_44, %c0_45] : memref<16x16xf32, #tpu.memory_space<vmem>>, vector<16x16xf32>
    %c0_46 = arith.constant 0 : index
    %c0_47 = arith.constant 0 : index
    %64 = vector.load %arg15[%c0_46, %c0_47] : memref<24x16xf32, #tpu.memory_space<vmem>>, vector<24x16xf32>
    %c0_48 = arith.constant 0 : index
    %c0_49 = arith.constant 0 : index
    %65 = vector.load %arg16[%c0_48, %c0_49] : memref<1x16xf32, #tpu.memory_space<vmem>>, vector<1x16xf32>
    %66 = arith.truncf %62 : vector<16x24xf32> to vector<16x24xbf16>
    %67 = arith.truncf %64 : vector<24x16xf32> to vector<24x16xbf16>
    %cst_50 = arith.constant dense<0.000000e+00> : vector<16x16xf32>
    %68 = tpu.matmul %66, %67, %cst_50 {dimension_numbers = #tpu.dot_dimension_numbers<[1], [0], [0], [1], [0, 0, 1, 1], [], []>} : vector<16x24xbf16>, vector<24x16xbf16>, vector<16x16xf32> -> vector<16x16xf32>
    %69 = arith.truncf %63 : vector<16x16xf32> to vector<16x16xbf16>
    %70 = arith.truncf %68 : vector<16x16xf32> to vector<16x16xbf16>
    %cst_51 = arith.constant dense<0.000000e+00> : vector<16x16xf32>
    %71 = tpu.matmul %69, %70, %cst_51 {dimension_numbers = #tpu.dot_dimension_numbers<[1], [0], [0], [1], [0, 0, 1, 1], [], []>} : vector<16x16xbf16>, vector<16x16xbf16>, vector<16x16xf32> -> vector<16x16xf32>
    %72 = vector.broadcast %65 : vector<1x16xf32> to vector<16x16xf32>
    %73 = arith.addf %71, %72 : vector<16x16xf32>
    %cst_52 = arith.constant 0.000000e+00 : f32
    %74 = vector.broadcast %cst_52 : f32 to vector<16x16xf32>
    %75 = arith.maximumf %73, %74 : vector<16x16xf32>
    %76 = tpu.concatenate %49, %62, %75 in 1 : vector<16x32xf32>, vector<16x24xf32>, vector<16x16xf32> -> vector<16x72xf32>
    %c0_53 = arith.constant 0 : index
    %c0_54 = arith.constant 0 : index
    %77 = vector.load %arg17[%c0_53, %c0_54] : memref<16x72xf32, #tpu.memory_space<vmem>>, vector<16x72xf32>
    tpu.vector_store %arg17[%c0_53, %c0_54], %76 {strides = array<i32>} : memref<16x72xf32, #tpu.memory_space<vmem>>, vector<16x72xf32>,
    return
  }
}

</mosaic_0001>

<bundles_post_ra>
// kernel: gripnet_forward_fused.1
= control target key start
LH: loop header
LB: loop body
LE: loop exit
PB: predicated region body
PF: predicated region fallthrough
CT: control target
= control target key end

     0   :  { %s1406_s0 = inlined_call_operand.vmem [shape: f32[24,32], index: 0, kind: input, shape index: {}]   ;;  %s1407_s1 = inlined_call_operand.vmem [shape: f32[32,16], index: 1, kind: input, shape index: {}]   ;;  %s1408_s2 = inlined_call_operand.vmem [shape: f32[24,24], index: 2, kind: input, shape index: {}]   ;;  %s1409_s3 = inlined_call_operand.vmem [shape: f32[16,16], index: 3, kind: input, shape index: {}]   ;;  %s1410_s4 = inlined_call_operand.hbm [shape: f32[1,16], index: 4, kind: input, shape index: {}]   ;;  %s1411_s5 = inlined_call_operand.vmem [shape: f32[16,16], index: 5, kind: input, shape index: {}]   ;;  %s1412_s6 = inlined_call_operand.hbm [shape: f32[1,16], index: 6, kind: input, shape index: {}]   ;;  %s1413_s7 = inlined_call_operand.vmem [shape: f32[16,24], index: 7, kind: input, shape index: {}]   ;;  %s1414_s8 = inlined_call_operand.vmem [shape: f32[16,16], index: 8, kind: input, shape index: {}]   ;;  %s1415_s9 = inlined_call_operand.hbm [shape: f32[1,16], index: 9, kind: input, shape index: {}]   ;;  %s1416_s10 = inlined_call_operand.vmem [shape: f32[16,16], index: 10, kind: input, shape index: {}]   ;;  %s1417_s11 = inlined_call_operand.vmem [shape: f32[16,16], index: 11, kind: input, shape index: {}]   ;;  %s1418_s12 = inlined_call_operand.vmem [shape: f32[16,16], index: 12, kind: input, shape index: {}]   ;;  %s1419_s13 = inlined_call_operand.vmem [shape: f32[32,24], index: 13, kind: input, shape index: {}]   ;;  %s1420_s14 = inlined_call_operand.vmem [shape: f32[1,24], index: 14, kind: input, shape index: {}]   ;;  %s1421_s15 = inlined_call_operand.vmem [shape: f32[24,16], index: 15, kind: input, shape index: {}]   ;;  %s1422_s16 = inlined_call_operand.vmem [shape: f32[1,16], index: 16, kind: input, shape index: {}]   ;;  %s1423_s17 = inlined_call_operand.hbm [shape: f32[16,72], index: 17, kind: output, shape index: {}]  }
   0x1   :  { %1426 = sst [smem:[#allocation12_spill]] %s1406_s0 }
   0x2   :  { %1427 = sst [smem:[#allocation13_spill]] %s1407_s1 }
   0x3   :  { %22 = vsyncpa [#allocation3], 0 }
   0x4   :  { %23 = vsyncpa [#allocation6], 0 }
   0x5   :  { %24 = vsyncpa [#allocation4], 0  ;;  %s1101_s24 = smov [#allocation5]   ;;  %s1102_s26 = smov [#allocation2]  }
   0x6   :  { %s51_s25 = sshll.u32 %s1101_s24, 4  ;;  %s39_s27 = sshll.u32 %s1102_s26, 4  ;;  %s52_s25 = int_to_ptr.vmem [resolvable:$true] %s51_s25  ;;  %s40_s27 = int_to_ptr.vmem [resolvable:$true] %s39_s27 }
   0x7   :  { %s1007_s0 = scalar_lea.hbm %s1412_s6, 16 }
   0x8   :  { %p1008_p0 = scmp.ne.s32.totalorder %s1412_s6, %s1007_s0  ;;  %p1011_p1 = scmp.lt.u32.totalorder %s1007_s0, %s1412_s6 }
   0xa   :  { %p1013_p2 = pnand %p1011_p1, %p1008_p0 }
   0xc   :  { %1016 = shalt.err (!%p1013_p2)
}
   0xd   :  { %s1017_s20 = scalar_lea.vmem %s52_s25, 16  ;;  %s1021_s21 = scalar_lea.vmem %s52_s25, 32 }
   0xe   :  { %p1018_p3 = scmp.ne.s32.totalorder %s52_s25, %s1017_s20  ;;  %p1022_p4 = scmp.lt.s32.totalorder %s52_s25, %s52_s25 }
   0xf   :  { %p1023_p5 = scmp.lt.s32.totalorder %s1021_s21, %s1017_s20 }
  0x11   :  { %p1024_p6 = por %p1023_p5, %p1022_p4 }
  0x13   :  { %p1025_p7 = pnand %p1024_p6, %p1018_p3 }
  0x15   :  { %1028 = shalt.err (!%p1025_p7)
}
  0x16   :  { %54 = dma.hbm_to_vmem [thread:$0]  %s1412_s6, 16, %s52_s25, [#allocation6]  }
  0x17   :  { %s1029_s28 = scalar_lea.hbm %s1410_s4, 16 }
  0x18   :  { %p1030_p8 = scmp.ne.s32.totalorder %s1410_s4, %s1029_s28  ;;  %p1033_p9 = scmp.lt.u32.totalorder %s1029_s28, %s1410_s4 }
  0x1a   :  { %p1035_p10 = pnand %p1033_p9, %p1030_p8 }
  0x1c   :  { %1038 = shalt.err (!%p1035_p10)
}
  0x1d   :  { %s1039_s19 = scalar_lea.vmem %s40_s27, 16  ;;  %s1043_s1 = scalar_lea.vmem %s40_s27, 32 }
  0x1e   :  { %p1040_p11 = scmp.ne.s32.totalorder %s40_s27, %s1039_s19  ;;  %p1044_p12 = scmp.lt.s32.totalorder %s40_s27, %s40_s27 }
  0x1f   :  { %p1045_p13 = scmp.lt.s32.totalorder %s1043_s1, %s1039_s19 }
  0x21   :  { %p1046_p0 = por %p1045_p13, %p1044_p12 }
  0x23   :  { %p1047_p1 = pnand %p1046_p0, %p1040_p11 }
  0x25   :  { %1050 = shalt.err (!%p1047_p1)
}
  0x26   :  { %42 = dma.hbm_to_vmem [thread:$0]  %s1410_s4, 16, %s40_s27, [#allocation3]  }
  0x27   :  { %s1103_s20 = smov [#allocation7]   ;;  %s1051_s24 = scalar_lea.hbm %s1415_s9, 16 }
  0x28   :  { %s65_s21 = sshll.u32 %s1103_s20, 4  ;;  %p1052_p2 = scmp.ne.s32.totalorder %s1415_s9, %s1051_s24  ;;  %s66_s21 = int_to_ptr.vmem [resolvable:$true] %s65_s21 }
  0x29   :  { %p1055_p3 = scmp.lt.u32.totalorder %s1051_s24, %s1415_s9 }
  0x2b   :  { %p1057_p4 = pnand %p1055_p3, %p1052_p2 }
  0x2d   :  { %1060 = shalt.err (!%p1057_p4)
}
  0x2e   :  { %s1061_s30 = scalar_lea.vmem %s66_s21, 16  ;;  %s1065_s4 = scalar_lea.vmem %s66_s21, 32 }
  0x2f   :  { %p1062_p5 = scmp.ne.s32.totalorder %s66_s21, %s1061_s30  ;;  %p1066_p6 = scmp.lt.s32.totalorder %s66_s21, %s66_s21 }
  0x30   :  { %p1067_p7 = scmp.lt.s32.totalorder %s1065_s4, %s1061_s30 }
  0x32   :  { %p1068_p8 = por %p1067_p7, %p1066_p6 }
  0x34   :  { %p1069_p9 = pnand %p1068_p8, %p1062_p5 }
  0x36   :  { %1072 = shalt.err (!%p1069_p9)
}
  0x37   :  { %68 = dma.hbm_to_vmem [thread:$0]  %s1415_s9, 16, %s66_s21, [#allocation6]  }
  0x38   :  { %1095 = dma.done.wait [#allocation3], 16  }
  0x39   :  { %1096 = vsyncadd [#allocation3], 4294967280 }
  0x3a   :  { %1097 = dma.done.wait [#allocation6], 32  }
  0x3b   :  { %1098 = vsyncadd [#allocation6], 4294967264  ;;  %s1428_s6 = sld [smem:[#allocation13_spill]]  ;;  %s1429_s28 = sld [smem:[#allocation12_spill]]  ;;  %vm104_vm0 = vcmask 261120   ;;  %v162_v11 = vld [vmem:[%s1409_s3] sm:$0xff] }
  0x3c   :  { %v163_v12 = vld [vmem:[%s1409_s3 + $0x8] sm:$0xff]  ;;  %vm168_vm1 = vcmask 130048   ;;  %v159_v20 = vld [vmem:[%s1408_s2] sm:$0xff]  ;;  %vm233_vm2 = vcmask 195584   ;;  %vm240_vm3 = vcmask 1043456   ;;  %v161_v29 = vld [vmem:[%s1408_s2 + $0x10] sm:$0xff] }
  0x3d   :  { %v167_v13 = vpack.c.bf16 %v163_v12, %v162_v11  ;;  %v160_v21 = vld [vmem:[%s1408_s2 + $0x8] sm:$0xff]  ;;  %v224_v31 = vpack.c.bf16 %v161_v29, %v161_v29  ;;  %v295_v32 = vld [vmem:[%s1411_s5] sm:$0xff]  ;;  %vm1105_vm4 = vmmov 0   ;;  %s1106_s21 = smov 16   ;;  %s1107_s19 = smov 32   ;;  %vm827_vm5 = vcmask 457728  }
  0x3e   :  { %v223_v22 = vpack.c.bf16 %v160_v21, %v159_v20  ;;  %v296_v33 = vld [vmem:[%s1411_s5 + $0x8] sm:$0xff]  ;;  %v855_v35 = vld [vmem:[#allocation2] ss:$0 sm:$0xff]  ;;  %v860_v58 = vld [vmem:[#allocation5] ss:$0 sm:$0xff]  ;;  %s1108_s1 = smov 56  }
  0x3f   :  { %918 = vmatprep.subr.bf16.mxu1 %v167_v13  ;;  %v300_v34 = vpack.c.bf16 %v296_v33, %v295_v32  ;;  %v419_v55 = vld [vmem:[%s1414_s8] sm:$0xff]  ;;  %v420_v56 = vld [vmem:[%s1414_s8 + $0x8] sm:$0xff]  ;;  %v602_v32 = vld [vmem:[%s1419_s13 + $0x18] sm:$0xff]  ;;  %vm830_vm6 = vcmask 588800  }
  0x40   :  { %919 = vmatpush3.bf16.msra.mxu1 %v167_v13  ;;  %v424_v57 = vpack.c.bf16 %v420_v56, %v419_v55  ;;  %v538_v12 = vld [vmem:[%s1416_s10 + $0x8] sm:$0xff]  ;;  %v417_v20 = vld [vmem:[%s1413_s7] sm:$0xff] }
  0x41   :  { %v96_v0 = vld [vmem:[%s1428_s6] sm:$0xff]  ;;  %v97_v1 = vld [vmem:[%s1428_s6 + $0x8] sm:$0xff]  ;;  %v98_v2 = vld [vmem:[%s1428_s6 + $0x10] sm:$0xff] }
  0x42   :  { %v102_v3 = vpack.c.bf16 %v97_v1, %v96_v0  ;;  %v99_v4 = vld [vmem:[%s1428_s6 + $0x18] sm:$0xff]  ;;  %v93_v5 = vld [vmem:[%s1429_s28] sm:$0xff]  ;;  %v94_v6 = vld [vmem:[%s1429_s28 + $0x8] sm:$0xff] }
  0x43   :  { %v103_v7 = vpack.c.bf16 %v99_v4, %v98_v2  ;;  %v100_v8 = vpack.c.bf16 %v94_v6, %v93_v5  ;;  %v95_v9 = vld [vmem:[%s1429_s28 + $0x10] sm:$0xff]  ;;  %v418_v21 = vld [vmem:[%s1413_s7 + $0x8] sm:$0xff]  ;;  %v705_v56 = vld [vmem:[%s1421_s15] sm:$0xff] }
  0x44   :  { %910 = vmatprep.subr.bf16.mxu0 %v102_v3  ;;  %v101_v10 = vpack.c.bf16 %v95_v9, %v95_v9  ;;  %v540_v9 = vld [vmem:[%s1417_s11 + $0x8] sm:$0xff] }
  0x45   :  { %911 = vmatpush3.bf16.msra.mxu0 %v102_v3  ;;  %914 = vmatprep.mubr.msk.bf16.mxu0 %vm104_vm0, %v100_v8  ;;  %v539_v8 = vld [vmem:[%s1417_s11] sm:$0xff]  ;;  %s1109_s11 = smov [#allocation8]  }
  0x46   :  { %912 = vmatprep.subr.bf16.mxu0 %v103_v7  ;;  %v542_v11 = vpack.c.bf16 %v540_v9, %v539_v8  ;;  %s838_s6 = sshll.u32 %s1109_s11, 4  ;;  %s839_s6 = int_to_ptr.vmem [resolvable:$true] %s838_s6 }
  0x47   :  { %p1078_p11 = scmp.lt.s32.totalorder %s839_s6, %s839_s6 }
  0x49   :  { %913 = vmatpush3.bf16.msra.mxu0 %v103_v7  ;;  %v1104_v7 = vmov 0.0  }
  0x4a   :  { %932 = vmatprep.subr.bf16.mxu0 %v300_v34 }
  0x4c   :  { %915 = vmatmul.mubr.msk.bf16.vlgmr.msra.gmra.mrb[0].mxu0 %vm104_vm0, %v101_v10  ;;  %v537_v10 = vld [vmem:[%s1416_s10] sm:$0xff] }
  0x4d   :  { %933 = vmatpush3.bf16.msra.mxu0 %v300_v34  ;;  %v541_v13 = vpack.c.bf16 %v538_v12, %v537_v10  ;;  %v865_v34 = vld [vmem:[#allocation7] ss:$0 sm:$0xff] }
  0x4e   :  { %946 = vmatprep.subr.bf16.mxu0 %v424_v57 }
 0x11f   :  { %v916_v14 = vpop.f32.mrb[0].mxu0 }
 0x120   :  { %v145_v15 = vpop.f32.mrb[1].mxu0  ;;  %v166_v19 = vpack.c.bf16 %v916_v14, %v916_v14 }
 0x121   :  { %v917_v16 = vpop.f32.mrb[2].mxu0 }
 0x122   :  { %v148_v17 = vpop.f32.mrb[3].mxu0 }
 0x123   :  { %v165_v18 = vpack.c.bf16 %v148_v17, %v145_v15 }
 0x125   :  { %920 = vmatprep.mubr.msk.bf16.mxu1 %vm168_vm1, %v165_v18 }
 0x126   :  { %921 = vmatmul.mubr.msk.bf16.vlgmr.msra.gmra.mrb[0].mxu1 %vm168_vm1, %v166_v19 }
 0x127   :  { %928 = vmatprep.mubr.msk.bf16.mxu1 %vm233_vm2, %v223_v22 }
 0x1f9   :  { %v922_v23 = vpop.f32.mrb[0].mxu1 }
 0x1fa   :  { %v209_v24 = vpop.f32.mrb[1].mxu1  ;;  %v226_v28 = vpack.c.bf16 %v922_v23, %v922_v23  ;;  %v479_v23 = vpack.c.bf16 %v418_v21, %v417_v20 }
 0x1fb   :  { %v923_v25 = vpop.f32.mrb[2].mxu1 }
 0x1fc   :  { %v212_v26 = vpop.f32.mrb[3].mxu1  ;;  %v242_v30 = vsel %vm240_vm3, %v226_v28, 0 }
 0x1fd   :  { %v225_v27 = vpack.c.bf16 %v212_v26, %v209_v24  ;;  %v599_v26 = vld [vmem:[%s1419_s13] sm:$0xff] }
 0x1ff   :  { %924 = vmatprep.subr.bf16.mxu1 %v225_v27 }
 0x200   :  { %925 = vmatpush3.bf16.msra.mxu1 %v225_v27  ;;  %v600_v27 = vld [vmem:[%s1419_s13 + $0x8] sm:$0xff] }
 0x201   :  { %994 = vmatprep.subr.msk.bf16.mxu1 %vm240_vm3, %v226_v28  ;;  %v605_v28 = vpack.c.bf16 %v600_v27, %v599_v26 }
 0x204   :  { %927 = vmatpush3.bf16.msra.mxu1 %v242_v30 }
 0x207   :  { %929 = vmatmul.mubr.msk.bf16.vlgmr.msra.gmra.mrb[4].mxu1 %vm233_vm2, %v224_v31 }
 0x208   :  { %942 = vmatprep.mubr.msk.bf16.mxu1 %vm233_vm2, %v223_v22 }
 0x2da   :  { %v930_v36 = vpop.f32.mrb[4].mxu1 }
 0x2db   :  { %v287_v37 = vadd.f32 %v930_v36, %v855_v35  ;;  %v278_v38 = vpop.f32.mrb[5].mxu1 }
 0x2dc   :  { %v279_v39 = vadd.f32 %v855_v35, %v278_v38  ;;  %v931_v40 = vpop.f32.mrb[6].mxu1 }
 0x2dd   :  { %v281_v41 = vpop.f32.mrb[7].mxu1  ;;  %v294_v43 = vmax.f32 %v287_v37, 0.0 }
 0x2de   :  { %v282_v42 = vadd.f32 %v855_v35, %v281_v41  ;;  %v292_v44 = vmax.f32 %v279_v39, 0.0 }
 0x2df   :  { %v299_v47 = vpack.c.bf16 %v294_v43, %v294_v43 }
 0x2e0   :  { %v293_v45 = vmax.f32 %v282_v42, 0.0 }
 0x2e2   :  { %v298_v46 = vpack.c.bf16 %v293_v45, %v292_v44 }
 0x2e4   :  { %934 = vmatprep.mubr.msk.bf16.mxu0 %vm168_vm1, %v298_v46 }
 0x2e5   :  { %935 = vmatmul.mubr.msk.bf16.vlgmr.msra.gmra.mrb[4].mxu0 %vm168_vm1, %v299_v47 }
 0x2e6   :  { %947 = vmatpush3.bf16.msra.mxu0 %v424_v57  ;;  %v706_v57 = vld [vmem:[%s1421_s15 + $0x8] sm:$0xff] }
 0x2e7   :  { %960 = vmatprep.subr.bf16.mxu0 %v1104_v7 }
 0x3b8   :  { %v936_v48 = vpop.f32.mrb[4].mxu0 }
 0x3b9   :  { %v341_v49 = vpop.f32.mrb[5].mxu0  ;;  %v356_v53 = vpack.c.bf16 %v936_v48, %v936_v48 }
 0x3ba   :  { %v937_v50 = vpop.f32.mrb[6].mxu0 }
 0x3bb   :  { %v344_v51 = vpop.f32.mrb[7].mxu0  ;;  %v364_v54 = vsel %vm240_vm3, %v356_v53, 0  ;;  %v597_v50 = vld [vmem:[%s1418_s12] sm:$0xff] }
 0x3bc   :  { %v355_v52 = vpack.c.bf16 %v344_v51, %v341_v49  ;;  %v598_v51 = vld [vmem:[%s1418_s12 + $0x8] sm:$0xff] }
 0x3bd   :  { %v651_v55 = vpack.c.bf16 %v598_v51, %v597_v50 }
 0x3be   :  { %938 = vmatprep.subr.bf16.mxu1 %v355_v52 }
 0x3bf   :  { %939 = vmatpush3.bf16.msra.mxu1 %v355_v52 }
 0x3c0   :  { %995 = vmatprep.subr.msk.bf16.mxu1 %vm240_vm3, %v356_v53 }
 0x3c3   :  { %941 = vmatpush3.bf16.msra.mxu1 %v364_v54 }
 0x3c4   :  { %952 = vmatprep.subr.bf16.mxu1 %v1104_v7 }
 0x3c6   :  { %943 = vmatmul.mubr.msk.bf16.vlgmr.msra.gmra.mrb[8].mxu1 %vm233_vm2, %v224_v31  ;;  %v601_v31 = vld [vmem:[%s1419_s13 + $0x10] sm:$0xff] }
 0x3c7   :  { %956 = vmatprep.mubr.msk.bf16.mxu1 %vm1105_vm4, %v1104_v7  ;;  %v606_v33 = vpack.c.bf16 %v602_v32, %v601_v31 }
 0x499   :  { %v944_v59 = vpop.f32.mrb[8].mxu1 }
 0x49a   :  { %v409_v60 = vadd.f32 %v944_v59, %v860_v58  ;;  %v400_v61 = vpop.f32.mrb[9].mxu1  ;;  %v707_v59 = vld [vmem:[%s1421_s15 + $0x10] sm:$0xff] }
 0x49b   :  { %v401_v62 = vadd.f32 %v860_v58, %v400_v61  ;;  %v945_v63 = vpop.f32.mrb[10].mxu1 }
 0x49c   :  { %v403_v0 = vpop.f32.mrb[11].mxu1  ;;  %v416_v2 = vmax.f32 %v409_v60, 0.0  ;;  %v711_v60 = vpack.c.bf16 %v707_v59, %v707_v59 }
 0x49d   :  { %v404_v1 = vadd.f32 %v860_v58, %v403_v0  ;;  %v414_v3 = vmax.f32 %v401_v62, 0.0  ;;  %v710_v58 = vpack.c.bf16 %v706_v57, %v705_v56  ;;  %v869_v62 = vld [vmem:[%s1420_s14] ss:$0 sm:$0xff] }
 0x49e   :  { %v423_v6 = vpack.c.bf16 %v416_v2, %v416_v2  ;;  %v716_v61 = vsel %vm240_vm3, %v711_v60, 0 }
 0x49f   :  { %v415_v4 = vmax.f32 %v404_v1, 0.0 }
 0x4a1   :  { %v422_v5 = vpack.c.bf16 %v415_v4, %v414_v3 }
 0x4a3   :  { %948 = vmatprep.mubr.msk.bf16.mxu0 %vm168_vm1, %v422_v5 }
 0x4a4   :  { %949 = vmatmul.mubr.msk.bf16.vlgmr.msra.gmra.mrb[8].mxu0 %vm168_vm1, %v423_v6 }
 0x4a5   :  { %962 = vmatprep.mubr.msk.bf16.mxu0 %vm1105_vm4, %v1104_v7  ;;  %961 = vmatpush3.bf16.msra.mxu0 %v542_v11 }
 0x4a6   :  { %974 = vmatprep.subr.bf16.mxu0 %v1104_v7 }
 0x4ac   :  { %963 = vmatmul.mubr.msk.bf16.vlgmr.msra.gmra.mrb[12].mxu0 %vm168_vm1, %v541_v13  ;;  %v872_v13 = vld [vmem:[%s1422_s16] ss:$0 sm:$0xff]  ;;  %s1073_s16 = scalar_lea.vmem %s839_s6, 256 }
 0x4ad   :  { %976 = vmatprep.mubr.msk.bf16.mxu0 %vm1105_vm4, %v1104_v7  ;;  %p1074_p10 = scmp.ne.s32.totalorder %s839_s6, %s1073_s16  ;;  %p1079_p12 = scmp.lt.s32.totalorder %s1073_s16, %s1073_s16 }
 0x4af   :  { %p1080_p13 = por %p1079_p12, %p1078_p11 }
 0x4b1   :  { %p1081_p0 = pnand %p1080_p13, %p1074_p10 }
 0x577   :  { %v950_v14 = vpop.f32.mrb[8].mxu0 }
 0x578   :  { %v465_v15 = vpop.f32.mrb[9].mxu0  ;;  %v481_v19 = vpack.c.bf16 %v950_v14, %v950_v14 }
 0x579   :  { %v951_v16 = vpop.f32.mrb[10].mxu0 }
 0x57a   :  { %v468_v17 = vpop.f32.mrb[11].mxu0  ;;  %v492_v22 = vsel %vm240_vm3, %v481_v19, 0 }
 0x57b   :  { %v480_v18 = vpack.c.bf16 %v468_v17, %v465_v15 }
 0x57d   :  { %953 = vmatpush3.bf16.msra.mxu1 %v480_v18 }
 0x57e   :  { %954 = vmatprep.subr.bf16.mxu1 %v1104_v7 }
 0x57f   :  { %v580_v24 = vpop.f32.mrb[12].mxu0 }
 0x580   :  { %v964_v25 = vpop.f32.mrb[13].mxu0 }
 0x581   :  { %955 = vmatpush3.bf16.msra.mxu1 %v492_v22  ;;  %v583_v29 = vpop.f32.mrb[14].mxu0 }
 0x582   :  { %966 = vmatprep.subr.bf16.mxu1 %v1104_v7  ;;  %v965_v30 = vpop.f32.mrb[15].mxu0 }
 0x584   :  { %957 = vmatmul.mubr.msk.bf16.vlgmr.msra.gmra.mrb[12].mxu1 %vm233_vm2, %v479_v23 }
 0x585   :  { %970 = vmatprep.mubr.msk.bf16.mxu1 %vm1105_vm4, %v1104_v7  ;;  %967 = vmatpush3.bf16.msra.mxu1 %v605_v28 }
 0x586   :  { %968 = vmatprep.subr.bf16.mxu1 %v1104_v7 }
 0x589   :  { %969 = vmatpush3.bf16.msra.mxu1 %v606_v33 }
 0x58a   :  { %980 = vmatprep.subr.bf16.mxu1 %v1104_v7 }
 0x657   :  { %v528_v35 = vpop.f32.mrb[12].mxu1 }
 0x658   :  { %v529_v36 = vadd.f32 %v865_v34, %v528_v35  ;;  %v958_v37 = vpop.f32.mrb[13].mxu1 }
 0x659   :  { %v531_v38 = vpop.f32.mrb[14].mxu1 }
 0x65a   :  { %v535_v39 = vmax.f32 %v529_v36, 0.0  ;;  %v532_v40 = vadd.f32 %v865_v34, %v531_v38  ;;  %v959_v41 = vpop.f32.mrb[15].mxu1 }
 0x65c   :  { %589 = vrot.lane.b32.xlu0 %v535_v39, %s1106_s21  ;;  %v536_v42 = vmax.f32 %v532_v40, 0.0 }
 0x660   :  { %591 = vrot.lane.b32.xlu0 %v536_v42, %s1106_s21 }
 0x6ce   :  { %v590_v43 = vpop.permute.xlu0 %589 }
 0x6cf   :  { %v1351_v45 = vsel %vm168_vm1, %v580_v24, %v590_v43 }
 0x6d2   :  { %v592_v44 = vpop.permute.xlu0 %591 }
 0x6d3   :  { %v1354_v46 = vsel %vm168_vm1, %v583_v29, %v592_v44 }
 0x6d4   :  { %v604_v47 = vpack.c.bf16 %v1354_v46, %v1351_v45 }
 0x6d6   :  { %971 = vmatmul.mubr.msk.bf16.vlgmr.msra.gmra.mrb[16].mxu1 %vm104_vm0, %v604_v47 }
 0x6d7   :  { %984 = vmatprep.mubr.msk.bf16.mxu1 %vm1105_vm4, %v1104_v7  ;;  %981 = vmatpush3.bf16.msra.mxu1 %v710_v58 }
 0x6d8   :  { %982 = vmatprep.subr.bf16.mxu1 %v1104_v7 }
 0x6db   :  { %983 = vmatpush3.bf16.msra.mxu1 %v716_v61 }
 0x7a9   :  { %v644_v48 = vpop.f32.mrb[16].mxu1 }
 0x7aa   :  { %v972_v49 = vpop.f32.mrb[17].mxu1 }
 0x7ab   :  { %v647_v52 = vpop.f32.mrb[18].mxu1 }
 0x7ac   :  { %v652_v53 = vpack.c.bf16 %v647_v52, %v644_v48  ;;  %v973_v54 = vpop.f32.mrb[19].mxu1 }
 0x7ae   :  { %975 = vmatpush3.bf16.msra.mxu0 %v652_v53 }
 0x7af   :  { %988 = vmatprep.subr.bf16.mxu0 %v1104_v7 }
 0x7b1   :  { %977 = vmatmul.mubr.msk.bf16.vlgmr.msra.gmra.mrb[16].mxu0 %vm168_vm1, %v651_v55 }
 0x7b2   :  { %990 = vmatprep.mubr.msk.bf16.mxu0 %vm1105_vm4, %v1104_v7 }
 0x884   :  { %v696_v63 = vpop.f32.mrb[16].mxu0 }
 0x885   :  { %v697_v0 = vadd.f32 %v869_v62, %v696_v63  ;;  %v978_v1 = vpop.f32.mrb[17].mxu0 }
 0x886   :  { %v699_v2 = vpop.f32.mrb[18].mxu0 }
 0x887   :  { %v703_v3 = vmax.f32 %v697_v0, 0.0  ;;  %v700_v4 = vadd.f32 %v869_v62, %v699_v2  ;;  %v979_v5 = vpop.f32.mrb[19].mxu0 }
 0x889   :  { %v704_v6 = vmax.f32 %v700_v4, 0.0  ;;  %811 = vrot.lane.b32.xlu1 %v703_v3, %s1107_s19 }
 0x88b   :  { %v709_v8 = vpack.c.bf16 %v704_v6, %v703_v3 }
 0x88d   :  { %813 = vrot.lane.b32.xlu1 %v704_v6, %s1107_s19  ;;  %985 = vmatmul.mubr.msk.bf16.vlgmr.msra.gmra.mrb[20].mxu1 %vm233_vm2, %v709_v8 }
 0x8fb   :  { %v812_v22 = vpop.permute.xlu1 %811 }
 0x8fc   :  { %v825_v24 = vsel %vm104_vm0, %v1351_v45, %v812_v22 }
 0x8ff   :  { %v814_v23 = vpop.permute.xlu1 %813 }
 0x900   :  { %v826_v27 = vsel %vm104_vm0, %v1354_v46, %v814_v23 }
 0x960   :  { %v752_v7 = vpop.f32.mrb[20].mxu1 }
 0x961   :  { %v986_v9 = vpop.f32.mrb[21].mxu1 }
 0x962   :  { %v755_v10 = vpop.f32.mrb[22].mxu1 }
 0x963   :  { %v759_v11 = vpack.c.bf16 %v755_v10, %v752_v7  ;;  %v987_v12 = vpop.f32.mrb[23].mxu1 }
 0x965   :  { %989 = vmatpush3.bf16.msra.mxu0 %v759_v11 }
 0x968   :  { %991 = vmatmul.mubr.msk.bf16.vlgmr.msra.gmra.mrb[20].mxu0 %vm168_vm1, %v651_v55 }
 0xa3b   :  { %v800_v14 = vpop.f32.mrb[20].mxu0 }
 0xa3c   :  { %v801_v15 = vadd.f32 %v872_v13, %v800_v14  ;;  %v992_v16 = vpop.f32.mrb[21].mxu0 }
 0xa3d   :  { %v803_v17 = vpop.f32.mrb[22].mxu0 }
 0xa3e   :  { %v807_v18 = vmax.f32 %v801_v15, 0.0  ;;  %v804_v19 = vadd.f32 %v872_v13, %v803_v17  ;;  %v993_v20 = vpop.f32.mrb[23].mxu0 }
 0xa40   :  { %v808_v21 = vmax.f32 %v804_v19, 0.0  ;;  %819 = vrot.lane.b32.xlu0 %v807_v18, %s1108_s1 }
 0xa42   :  { %821 = vrot.lane.b32.xlu1 %v808_v21, %s1108_s1 }
 0xab2   :  { %v820_v25 = vpop.permute.xlu0 %819 }
 0xab3   :  { %v828_v26 = vsel %vm827_vm5, %v825_v24, %v820_v25 }
 0xab4   :  { %831 = vst.msk [vmem:[#allocation8] sm:$0xff] %vm830_vm6, %v828_v26  ;;  %v822_v28 = vpop.permute.xlu1 %821 }
 0xab5   :  { %v829_v29 = vsel %vm827_vm5, %v826_v27, %v822_v28 }
 0xab6   :  { %832 = vst.msk [vmem:[#allocation8 + $0x8] sm:$0xff] %vm830_vm6, %v829_v29 }
 0xab7   :  { %1084 = shalt.err (!%p1081_p0)
}
 0xab8   :  { %s1085_s20 = scalar_lea.hbm %s1423_s17, 256 }
 0xab9   :  { %p1086_p1 = scmp.ne.s32.totalorder %s1423_s17, %s1085_s20  ;;  %p1089_p2 = scmp.lt.u32.totalorder %s1085_s20, %s1423_s17 }
 0xabb   :  { %p1091_p3 = pnand %p1089_p2, %p1086_p1 }
 0xabd   :  { %1094 = shalt.err (!%p1091_p3)
}
 0xabe   :  { %s1110_s24 = smov 128   ;;  %s1111_s26 = smov 8  }
 0xabf   :  { %844 = dma.vmem_to_hbm [thread:$0]  %s839_s6, 256, %s1423_s17, [#allocation4], %s1110_s24, %s1110_s24, %s1111_s26  }
 0xac0   :  { %1099 = dma.done.wait [#allocation4], 256  }
 0xac1   :  { %1100 = vsyncadd [#allocation4], 4294967040 }
 0xac2   :  { %848 = vsyncpa [#allocation3], 1 }
 0xac3   :  { %849 = vsyncpa [#allocation6], 1 }
 0xac4   :  { %850 = vsyncpa [#allocation4], 1 }

</bundles_post_ra>
